<compile_context>
chip_gen: v7x
topology: tpu7x:2x2x1
jax: 0.10.0
libtpu: 0.0.40
codegen_flags: <defaults>
</compile_context>

<pallas_src>
import functools

import jax
import jax.numpy as jnp
from jax.experimental import pallas as pl
from jax.experimental.pallas import tpu as pltpu

NEG_SLOPE = 0.01   # nn.LeakyReLU default negative_slope
BN_EPS = 1e-5      # nn.BatchNorm1d default eps


def _leaky_relu(h):
    return jnp.where(h >= 0, h, NEG_SLOPE * h)


# ----------------------------------------------------------------------------- kernel
def mlp_kernel(x_ref,
               w1_ref, c1_ref,
               w2_ref, c2_ref,
               w3_ref, c3_ref,
               w4_ref, b4_ref,
               o_ref, *, act_dtype):
    # Block 1: Linear + (folded) BN + LeakyReLU   (Dropout = identity in eval).
    # The f32 -> bf16 cast for the MXU happens here, not as a separate XLA pass.
    x = x_ref[...].astype(w1_ref.dtype)
    h = jnp.dot(x, w1_ref[...], preferred_element_type=jnp.float32)
    h = _leaky_relu((h + c1_ref[...]).astype(act_dtype)).astype(w2_ref.dtype)

    # Block 2
    h = jnp.dot(h, w2_ref[...], preferred_element_type=jnp.float32)
    h = _leaky_relu((h + c2_ref[...]).astype(act_dtype)).astype(w3_ref.dtype)

    # Block 3
    h = jnp.dot(h, w3_ref[...], preferred_element_type=jnp.float32)
    h = _leaky_relu((h + c3_ref[...]).astype(act_dtype))

    # Head: K = hidden//4, N = 1  ->  VPU multiply + lane reduce (skip the MXU),
    # then one small (tile,1)->(1,tile) transpose (XLU) for a lane-dense store.
    col = (jnp.sum(h.astype(jnp.float32) * w4_ref[...], axis=-1, keepdims=True)
           + b4_ref[...])                         # (tile, 1) f32
    o_ref[...] = jnp.transpose(col)               # (1, tile) lane-dense


# ----------------------------------------------------------------------------- params
def make_params(key, input_size, hidden_size):
    """PyTorch-style deterministic init: uniform Linear weights; BN affine
    params perturbed so the BN path is actually exercised (running stats =
    defaults: mean 0, var 1)."""
    sizes = [(input_size, hidden_size),
             (hidden_size, hidden_size // 2),
             (hidden_size // 2, hidden_size // 4),
             (hidden_size // 4, 1)]
    params = {}
    keys = jax.random.split(key, 16)
    ki = 0
    for li, (fin, fout) in enumerate(sizes, start=1):
        bound = 1.0 / jnp.sqrt(fin)
        params[f"w{li}"] = jax.random.uniform(
            keys[ki], (fin, fout), jnp.float32, -bound, bound); ki += 1
        params[f"b{li}"] = jax.random.uniform(
            keys[ki], (1, fout), jnp.float32, -bound, bound); ki += 1
        if li < 4:  # BatchNorm1d follows the first three Linears
            gamma = 1.0 + 0.1 * jax.random.normal(keys[ki], (1, fout), jnp.float32); ki += 1
            beta = 0.1 * jax.random.normal(keys[ki], (1, fout), jnp.float32); ki += 1
            running_mean = jnp.zeros((1, fout), jnp.float32)
            running_var = jnp.ones((1, fout), jnp.float32)
            scale = gamma / jnp.sqrt(running_var + BN_EPS)
            shift = beta - running_mean * scale
            params[f"s{li}"] = scale
            params[f"t{li}"] = shift
    return params


def fold_params(params, compute_dtype=jnp.bfloat16):
    """Fold BN (scale, shift) and the Linear bias into the weights (in f32,
    before the bf16 cast):  W' = W * scale (per output column),
    c' = b * scale + shift."""
    fp = {}
    for li in (1, 2, 3):
        w, b = params[f"w{li}"], params[f"b{li}"]
        s, t = params[f"s{li}"], params[f"t{li}"]
        fp[f"w{li}"] = (w * s).astype(compute_dtype)           # MXU input
        fp[f"c{li}"] = (b * s + t).astype(jnp.float32)         # bias add in f32 acc
    fp["w4"] = params["w4"].reshape(1, -1).astype(jnp.float32)  # (1, hidden//4)
    fp["b4"] = params["b4"].reshape(1, 1).astype(jnp.float32)
    return fp


def _act_dtype():
    """bf16 epilogue on chips with a bf16 VPU (v6e / v7x); f32 otherwise."""
    try:
        kind = jax.devices()[0].device_kind.lower()
    except Exception:
        return jnp.float32
    return jnp.bfloat16 if ("v6" in kind or "v7" in kind) else jnp.float32


# ----------------------------------------------------------------------------- wrapper
def mlp_forward(x, params, *, tile_n=1024):
    n, f = x.shape
    fp = fold_params(params)
    h1 = fp["w1"].shape[1]
    h2 = fp["w2"].shape[1]
    h3 = fp["w3"].shape[1]

    # Batch tile.  Small batches: one full block (block dims == array dims, so
    # layout constraints are trivially met).  Larger batches: tile is a multiple
    # of 128 (lane-dense output stores / 8-sublane x tiles) and capped so the
    # grid has >= 2 steps -> both v7x TensorCores get work via "parallel".
    tile_n = max(128, (int(tile_n) // 128) * 128)
    if n < 256:
        tn = n
    else:
        tn = min(tile_n, 128 * pl.cdiv(n, 256))
    grid = (pl.cdiv(n, tn),)

    row_map = lambda i: (i, 0)     # batch-tiled x
    out_map = lambda i: (0, i)     # (1, n) output, tiled along lanes
    const_map = lambda i: (0, 0)   # tiny weights/biases: VMEM-resident

    in_specs = [
        pl.BlockSpec((tn, f), row_map),
        pl.BlockSpec((f, h1), const_map), pl.BlockSpec((1, h1), const_map),
        pl.BlockSpec((h1, h2), const_map), pl.BlockSpec((1, h2), const_map),
        pl.BlockSpec((h2, h3), const_map), pl.BlockSpec((1, h3), const_map),
        pl.BlockSpec((1, h3), const_map), pl.BlockSpec((1, 1), const_map),
    ]
    out_spec = pl.BlockSpec((1, tn), out_map)

    flops = 2 * n * (f * h1 + h1 * h2 + h2 * h3 + h3)
    weight_bytes = sum(int(v.size) * v.dtype.itemsize for v in fp.values())
    bytes_accessed = n * f * 4 + weight_bytes + n * 4   # f32 x in, f32 row out
    cost = pl.CostEstimate(flops=flops, transcendentals=0,
                           bytes_accessed=bytes_accessed)

    kernel = functools.partial(mlp_kernel, act_dtype=_act_dtype())

    out_row = pl.pallas_call(
        kernel,
        out_shape=jax.ShapeDtypeStruct((1, n), jnp.float32),
        grid=grid,
        in_specs=in_specs,
        out_specs=out_spec,
        compiler_params=pltpu.CompilerParams(
            dimension_semantics=("parallel",),
            vmem_limit_bytes=32 * 1024 * 1024),
        cost_estimate=cost,
    )(x, fp["w1"], fp["c1"], fp["w2"], fp["c2"],
      fp["w3"], fp["c3"], fp["w4"], fp["b4"])

    return out_row.reshape(n, 1)


# ----------------------------------------------------------------------------- reference
def mlp_reference(x, p):
    """Exact eval-mode module semantics in float32 (unfolded params)."""
    h = x @ p["w1"] + p["b1"]
    h = _leaky_relu(h * p["s1"] + p["t1"])
    h = h @ p["w2"] + p["b2"]
    h = _leaky_relu(h * p["s2"] + p["t2"])
    h = h @ p["w3"] + p["b3"]
    h = _leaky_relu(h * p["s3"] + p["t3"])
    return h @ p["w4"] + p["b4"]


if __name__ == "__main__":
    input_size, hidden_size = 32, 32  # hidden//2 = 16, hidden//4 = 8
    key = jax.random.PRNGKey(0)
    kx, kp = jax.random.split(key)
    params = make_params(kp, input_size, hidden_size)

    # (batch, tile_n): single full block, multi-step even grid, ragged tail.
    for batch, tile in [(8, 1024), (384, 128), (300, 128)]:
        x = jax.random.normal(jax.random.fold_in(kx, batch),
                              (batch, input_size), jnp.float32)
        out = jax.block_until_ready(mlp_forward(x, params, tile_n=tile))
        ref = mlp_reference(x, params)
        assert out.shape == (batch, 1)
        # bf16 MXU inputs -> loosened tolerance vs. the f32 reference.
        assert jnp.allclose(out, ref, atol=5e-2, rtol=5e-2), (
            float(jnp.max(jnp.abs(out - ref))))

    print("KERNEL_OK")
</pallas_src>

<mosaic_0001>
module attributes {stable_mosaic.version = 11 : i64} {
  func.func @mlp_kernel(%arg0: i32, %arg1: memref<8x32xf32, #tpu.memory_space<vmem>>, %arg2: memref<32x32xbf16, #tpu.memory_space<vmem>>, %arg3: memref<1x32xf32, #tpu.memory_space<vmem>>, %arg4: memref<32x16xbf16, #tpu.memory_space<vmem>>, %arg5: memref<1x16xf32, #tpu.memory_space<vmem>>, %arg6: memref<16x8xbf16, #tpu.memory_space<vmem>>, %arg7: memref<1x8xf32, #tpu.memory_space<vmem>>, %arg8: memref<1x8xf32, #tpu.memory_space<vmem>>, %arg9: memref<1x1xf32, #tpu.memory_space<vmem>>, %arg10: memref<1x8xf32, #tpu.memory_space<vmem>>) attributes {dimension_semantics = [#tpu.dimension_semantics<parallel>], iteration_bounds = array<i64: 1>, scalar_prefetch = 0 : i64, scratch_operands = 0 : i64, tpu.core_type = #tpu.core_type<tc>, window_params = [{transform_indices = @transform_0, window_bounds = array<i64: 8, 32>}, {pipeline_mode = #tpu.pipeline_mode<synchronous>, transform_indices = @transform_1, window_bounds = array<i64: 32, 32>}, {pipeline_mode = #tpu.pipeline_mode<synchronous>, transform_indices = @transform_2, window_bounds = array<i64: 1, 32>}, {pipeline_mode = #tpu.pipeline_mode<synchronous>, transform_indices = @transform_3, window_bounds = array<i64: 32, 16>}, {pipeline_mode = #tpu.pipeline_mode<synchronous>, transform_indices = @transform_4, window_bounds = array<i64: 1, 16>}, {pipeline_mode = #tpu.pipeline_mode<synchronous>, transform_indices = @transform_5, window_bounds = array<i64: 16, 8>}, {pipeline_mode = #tpu.pipeline_mode<synchronous>, transform_indices = @transform_6, window_bounds = array<i64: 1, 8>}, {pipeline_mode = #tpu.pipeline_mode<synchronous>, transform_indices = @transform_7, window_bounds = array<i64: 1, 8>}, {pipeline_mode = #tpu.pipeline_mode<synchronous>, transform_indices = @transform_8, window_bounds = array<i64: 1, 1>}, {transform_indices = @transform_9, window_bounds = array<i64: 1, 8>}]} {
    %c0 = arith.constant 0 : index
    %c0_0 = arith.constant 0 : index
    %0 = vector.load %arg1[%c0, %c0_0] : memref<8x32xf32, #tpu.memory_space<vmem>>, vector<8x32xf32>
    %1 = arith.truncf %0 : vector<8x32xf32> to vector<8x32xbf16>
    %c0_1 = arith.constant 0 : index
    %c0_2 = arith.constant 0 : index
    %2 = vector.load %arg2[%c0_1, %c0_2] : memref<32x32xbf16, #tpu.memory_space<vmem>>, vector<32x32xbf16>
    %cst = arith.constant dense<0.000000e+00> : vector<8x32xf32>
    %3 = tpu.matmul %1, %2, %cst {dimension_numbers = #tpu.dot_dimension_numbers<[1], [0], [0], [1], [0, 0, 1, 1], [], []>} : vector<8x32xbf16>, vector<32x32xbf16>, vector<8x32xf32> -> vector<8x32xf32>
    %c0_3 = arith.constant 0 : index
    %c0_4 = arith.constant 0 : index
    %4 = vector.load %arg3[%c0_3, %c0_4] : memref<1x32xf32, #tpu.memory_space<vmem>>, vector<1x32xf32>
    %5 = vector.broadcast %4 : vector<1x32xf32> to vector<8x32xf32>
    %6 = arith.addf %3, %5 : vector<8x32xf32>
    %cst_5 = arith.constant 0.000000e+00 : f32
    %7 = vector.broadcast %cst_5 : f32 to vector<8x32xf32>
    %8 = arith.cmpf oge, %6, %7 : vector<8x32xf32>
    %cst_6 = arith.constant 0.00999999977 : f32
    %9 = vector.broadcast %cst_6 : f32 to vector<8x32xf32>
    %10 = arith.mulf %9, %6 : vector<8x32xf32>
    %11 = arith.select %8, %6, %10 : vector<8x32xi1>, vector<8x32xf32>
    %12 = arith.truncf %11 : vector<8x32xf32> to vector<8x32xbf16>
    %c0_7 = arith.constant 0 : index
    %c0_8 = arith.constant 0 : index
    %13 = vector.load %arg4[%c0_7, %c0_8] : memref<32x16xbf16, #tpu.memory_space<vmem>>, vector<32x16xbf16>
    %cst_9 = arith.constant dense<0.000000e+00> : vector<8x16xf32>
    %14 = tpu.matmul %12, %13, %cst_9 {dimension_numbers = #tpu.dot_dimension_numbers<[1], [0], [0], [1], [0, 0, 1, 1], [], []>} : vector<8x32xbf16>, vector<32x16xbf16>, vector<8x16xf32> -> vector<8x16xf32>
    %c0_10 = arith.constant 0 : index
    %c0_11 = arith.constant 0 : index
    %15 = vector.load %arg5[%c0_10, %c0_11] : memref<1x16xf32, #tpu.memory_space<vmem>>, vector<1x16xf32>
    %16 = vector.broadcast %15 : vector<1x16xf32> to vector<8x16xf32>
    %17 = arith.addf %14, %16 : vector<8x16xf32>
    %cst_12 = arith.constant 0.000000e+00 : f32
    %18 = vector.broadcast %cst_12 : f32 to vector<8x16xf32>
    %19 = arith.cmpf oge, %17, %18 : vector<8x16xf32>
    %cst_13 = arith.constant 0.00999999977 : f32
    %20 = vector.broadcast %cst_13 : f32 to vector<8x16xf32>
    %21 = arith.mulf %20, %17 : vector<8x16xf32>
    %22 = arith.select %19, %17, %21 : vector<8x16xi1>, vector<8x16xf32>
    %23 = arith.truncf %22 : vector<8x16xf32> to vector<8x16xbf16>
    %c0_14 = arith.constant 0 : index
    %c0_15 = arith.constant 0 : index
    %24 = vector.load %arg6[%c0_14, %c0_15] : memref<16x8xbf16, #tpu.memory_space<vmem>>, vector<16x8xbf16>
    %cst_16 = arith.constant dense<0.000000e+00> : vector<8x8xf32>
    %25 = tpu.matmul %23, %24, %cst_16 {dimension_numbers = #tpu.dot_dimension_numbers<[1], [0], [0], [1], [0, 0, 1, 1], [], []>} : vector<8x16xbf16>, vector<16x8xbf16>, vector<8x8xf32> -> vector<8x8xf32>
    %c0_17 = arith.constant 0 : index
    %c0_18 = arith.constant 0 : index
    %26 = vector.load %arg7[%c0_17, %c0_18] : memref<1x8xf32, #tpu.memory_space<vmem>>, vector<1x8xf32>
    %27 = vector.broadcast %26 : vector<1x8xf32> to vector<8x8xf32>
    %28 = arith.addf %25, %27 : vector<8x8xf32>
    %cst_19 = arith.constant 0.000000e+00 : f32
    %29 = vector.broadcast %cst_19 : f32 to vector<8x8xf32>
    %30 = arith.cmpf oge, %28, %29 : vector<8x8xf32>
    %cst_20 = arith.constant 0.00999999977 : f32
    %31 = vector.broadcast %cst_20 : f32 to vector<8x8xf32>
    %32 = arith.mulf %31, %28 : vector<8x8xf32>
    %33 = arith.select %30, %28, %32 : vector<8x8xi1>, vector<8x8xf32>
    %c0_21 = arith.constant 0 : index
    %c0_22 = arith.constant 0 : index
    %34 = vector.load %arg8[%c0_21, %c0_22] : memref<1x8xf32, #tpu.memory_space<vmem>>, vector<1x8xf32>
    %35 = vector.broadcast %34 : vector<1x8xf32> to vector<8x8xf32>
    %36 = arith.mulf %33, %35 : vector<8x8xf32>
    %cst_23 = arith.constant dense<0.000000e+00> : vector<8xf32>
    %37 = vector.multi_reduction <add>, %36, %cst_23 [1] : vector<8x8xf32> to vector<8xf32>
    %38 = vector.shape_cast %37 : vector<8xf32> to vector<8x1xf32>
    %c0_24 = arith.constant 0 : index
    %c0_25 = arith.constant 0 : index
    %39 = vector.load %arg9[%c0_24, %c0_25] : memref<1x1xf32, #tpu.memory_space<vmem>>, vector<1x1xf32>
    %40 = vector.broadcast %39 : vector<1x1xf32> to vector<8x1xf32>
    %41 = arith.addf %38, %40 : vector<8x1xf32>
    %42 = tpu.transpose %41, [1, 0] : vector<8x1xf32> -> vector<1x8xf32>
    %c0_26 = arith.constant 0 : index
    %c0_27 = arith.constant 0 : index
    %43 = vector.load %arg10[%c0_26, %c0_27] : memref<1x8xf32, #tpu.memory_space<vmem>>, vector<1x8xf32>
    tpu.vector_store %arg10[%c0_26, %c0_27], %42 {strides = array<i32>} : memref<1x8xf32, #tpu.memory_space<vmem>>, vector<1x8xf32>,
    return
  }
  func.func @transform_0(%arg0: i32) -> (i32, i32) {
    %c0_i32 = arith.constant 0 : i32
    %c0_i32_0 = arith.constant 0 : i32
    return %arg0, %c0_i32 : i32, i32
  }
  func.func @transform_1(%arg0: i32) -> (i32, i32) {
    %c0_i32 = arith.constant 0 : i32
    %c0_i32_0 = arith.constant 0 : i32
    %c0_i32_1 = arith.constant 0 : i32
    return %c0_i32, %c0_i32_0 : i32, i32
  }
  func.func @transform_2(%arg0: i32) -> (i32, i32) {
    %c0_i32 = arith.constant 0 : i32
    %c0_i32_0 = arith.constant 0 : i32
    %c0_i32_1 = arith.constant 0 : i32
    return %c0_i32, %c0_i32_0 : i32, i32
  }
  func.func @transform_3(%arg0: i32) -> (i32, i32) {
    %c0_i32 = arith.constant 0 : i32
    %c0_i32_0 = arith.constant 0 : i32
    %c0_i32_1 = arith.constant 0 : i32
    return %c0_i32, %c0_i32_0 : i32, i32
  }
  func.func @transform_4(%arg0: i32) -> (i32, i32) {
    %c0_i32 = arith.constant 0 : i32
    %c0_i32_0 = arith.constant 0 : i32
    %c0_i32_1 = arith.constant 0 : i32
    return %c0_i32, %c0_i32_0 : i32, i32
  }
  func.func @transform_5(%arg0: i32) -> (i32, i32) {
    %c0_i32 = arith.constant 0 : i32
    %c0_i32_0 = arith.constant 0 : i32
    %c0_i32_1 = arith.constant 0 : i32
    return %c0_i32, %c0_i32_0 : i32, i32
  }
  func.func @transform_6(%arg0: i32) -> (i32, i32) {
    %c0_i32 = arith.constant 0 : i32
    %c0_i32_0 = arith.constant 0 : i32
    %c0_i32_1 = arith.constant 0 : i32
    return %c0_i32, %c0_i32_0 : i32, i32
  }
  func.func @transform_7(%arg0: i32) -> (i32, i32) {
    %c0_i32 = arith.constant 0 : i32
    %c0_i32_0 = arith.constant 0 : i32
    %c0_i32_1 = arith.constant 0 : i32
    return %c0_i32, %c0_i32_0 : i32, i32
  }
  func.func @transform_8(%arg0: i32) -> (i32, i32) {
    %c0_i32 = arith.constant 0 : i32
    %c0_i32_0 = arith.constant 0 : i32
    %c0_i32_1 = arith.constant 0 : i32
    return %c0_i32, %c0_i32_0 : i32, i32
  }
  func.func @transform_9(%arg0: i32) -> (i32, i32) {
    %c0_i32 = arith.constant 0 : i32
    %c0_i32_0 = arith.constant 0 : i32
    return %c0_i32, %arg0 : i32, i32
  }
}

</mosaic_0001>

<bundles_post_ra>
// kernel: tpu_custom_call.1
= control target key start
LH: loop header
LB: loop body
LE: loop exit
PB: predicated region body
PF: predicated region fallthrough
CT: control target
= control target key end

     0   :  { %s484_s0 = inlined_call_operand.vmem [shape: f32[8,32], index: 0, kind: input, shape index: {}]   ;;  %s485_s1 = inlined_call_operand.vmem [shape: bf16[32,32], index: 1, kind: input, shape index: {}]   ;;  %s486_s2 = inlined_call_operand.vmem [shape: f32[1,32], index: 2, kind: input, shape index: {}]   ;;  %s487_s3 = inlined_call_operand.vmem [shape: bf16[32,16], index: 3, kind: input, shape index: {}]   ;;  %s488_s4 = inlined_call_operand.vmem [shape: f32[1,16], index: 4, kind: input, shape index: {}]   ;;  %s489_s5 = inlined_call_operand.vmem [shape: bf16[16,8], index: 5, kind: input, shape index: {}]   ;;  %s490_s6 = inlined_call_operand.vmem [shape: f32[1,8], index: 6, kind: input, shape index: {}]   ;;  %s491_s7 = inlined_call_operand.vmem [shape: f32[1,8], index: 7, kind: input, shape index: {}]   ;;  %s492_s8 = inlined_call_operand.<no memory space> [shape: f32[1,1], index: 8, kind: input, shape index: {}]   ;;  %s493_s9 = inlined_call_operand.hbm [shape: f32[1,8], index: 9, kind: output, shape index: {}]  }
   0x1   :  { %v14_v0 = vstv %s492_s8 }
   0x2   :  { %15 = vst [vmem:[#allocation2] sm:$0x1] %v14_v0 }
   0x3   :  { %v355_v1 = vld [vmem:[%s485_s1] sm:$0xff]   ;;  %v384_v2 = vmov 0.0   ;;  %v356_v3 = vld [vmem:[%s485_s1 + $0x8] sm:$0xff]   ;;  %vm385_vm0 = vmmov 0  }
   0x4   :  { %330 = vmatprep.subr.bf16.mxu0 %v384_v2  ;;  %338 = vmatprep.subr.bf16.mxu1 %v384_v2  ;;  %v36_v4 = vld [vmem:[%s484_s0] sm:$0xff] }
   0x5   :  { %331 = vmatpush3.bf16.msra.mxu0 %v355_v1  ;;  %334 = vmatprep.mubr.msk.bf16.mxu0 %vm385_vm0, %v384_v2 }
   0x6   :  { %332 = vmatprep.subr.bf16.mxu0 %v384_v2  ;;  %342 = vmatprep.mubr.msk.bf16.mxu1 %vm385_vm0, %v384_v2 }
   0x7   :  { %16 = vsyncpa [#allocation4], 0  ;;  %v37_v5 = vpack.c.bf16 %v36_v4, %v36_v4  ;;  %vm61_vm1 = vcmask 261120   ;;  %v357_v6 = vld [vmem:[%s487_s3] sm:$0xff]   ;;  %v358_v7 = vld [vmem:[%s487_s3 + $0x8] sm:$0xff]   ;;  %vm194_vm4 = vcmask 130048  }
   0x8   :  { %339 = vmatpush3.bf16.msra.mxu1 %v357_v6  ;;  %v309_v8 = vld [vmem:[%s486_s2] ss:$0 sm:$0xff]  ;;  %vm249_vm6 = vcmask 64512   ;;  %vm293_vm7 = vcmask 57344  }
   0x9   :  { %333 = vmatpush3.bf16.msra.mxu0 %v356_v3  ;;  %340 = vmatprep.subr.bf16.mxu1 %v384_v2  ;;  %v359_v17 = vld [vmem:[%s489_s5] sm:$0xff]  }
   0xa   :  { %346 = vmatprep.subr.bf16.mxu0 %v384_v2  ;;  %v313_v18 = vld [vmem:[%s488_s4] ss:$0 sm:$0xff] }
   0xb   :  { %v317_v27 = vld [vmem:[%s490_s6] ss:$0 sm:$0xff]  ;;  %s386_s6 = smov [#allocation3]  }
   0xc   :  { %335 = vmatmul.mubr.msk.bf16.vlgmr.msra.gmra.mrb[0].mxu0 %vm61_vm1, %v37_v5  ;;  %341 = vmatpush3.bf16.msra.mxu1 %v358_v7  ;;  %v320_v34 = vld [vmem:[%s491_s7] ss:$0 sm:$0xff]  ;;  %s301_s24 = sshll.u32 %s386_s6, 4  ;;  %s302_s24 = int_to_ptr.vmem [resolvable:$true] %s301_s24 }
   0xd   :  { %348 = vmatprep.mubr.msk.bf16.mxu0 %vm385_vm0, %v384_v2  ;;  %347 = vmatpush3.bf16.msra.mxu0 %v359_v17  ;;  %v321_v38 = vld [vmem:[#allocation2] ss:$0 sm:$0xff]  ;;  %s360_s25 = scalar_lea.vmem %s302_s24, 16  ;;  %s364_s26 = scalar_lea.vmem %s302_s24, 32 }
   0xe   :  { %p361_p0 = scmp.ne.s32.totalorder %s302_s24, %s360_s25  ;;  %p365_p1 = scmp.lt.s32.totalorder %s302_s24, %s302_s24 }
   0xf   :  { %p366_p2 = scmp.lt.s32.totalorder %s364_s26, %s360_s25 }
  0x11   :  { %p367_p3 = por %p366_p2, %p365_p1 }
  0x13   :  { %p368_p4 = pnand %p367_p3, %p361_p0 }
  0xdf   :  { %v99_v9 = vpop.f32.mrb[0].mxu0 }
  0xe0   :  { %v100_v10 = vadd.f32 %v309_v8, %v99_v9  ;;  %v336_v11 = vpop.f32.mrb[1].mxu0 }
  0xe1   :  { %v102_v12 = vpop.f32.mrb[2].mxu0 }
  0xe2   :  { %vm105_vm2 = vcmp.ge.f32.partialorder %v100_v10, 0.0  ;;  %v106_v13 = vmul.f32 0.01, %v100_v10  ;;  %v337_v14 = vpop.f32.mrb[3].mxu0 }
  0xe4   :  { %v107_v15 = vsel %vm105_vm2, %v100_v10, %v106_v13 }
  0xe5   :  { %v108_v16 = vpack.c.bf16 %v107_v15, %v107_v15 }
  0xe7   :  { %343 = vmatmul.mubr.msk.bf16.vlgmr.msra.gmra.mrb[0].mxu1 %vm61_vm1, %v108_v16 }
 0x1ba   :  { %v169_v19 = vpop.f32.mrb[0].mxu1 }
 0x1bb   :  { %v170_v20 = vadd.f32 %v313_v18, %v169_v19  ;;  %v344_v21 = vpop.f32.mrb[1].mxu1 }
 0x1bc   :  { %v172_v22 = vpop.f32.mrb[2].mxu1 }
 0x1bd   :  { %vm175_vm3 = vcmp.ge.f32.partialorder %v170_v20, 0.0  ;;  %v176_v23 = vmul.f32 0.01, %v170_v20  ;;  %v345_v24 = vpop.f32.mrb[3].mxu1 }
 0x1bf   :  { %v177_v25 = vsel %vm175_vm3, %v170_v20, %v176_v23 }
 0x1c0   :  { %v178_v26 = vpack.c.bf16 %v177_v25, %v177_v25 }
 0x1c2   :  { %349 = vmatmul.mubr.msk.bf16.vlgmr.msra.gmra.mrb[4].mxu0 %vm194_vm4, %v178_v26 }
 0x295   :  { %v232_v28 = vpop.f32.mrb[4].mxu0 }
 0x296   :  { %v233_v29 = vadd.f32 %v317_v27, %v232_v28  ;;  %v350_v30 = vpop.f32.mrb[5].mxu0 }
 0x297   :  { %v235_v31 = vpop.f32.mrb[6].mxu0 }
 0x298   :  { %v239_v32 = vmul.f32 0.01, %v233_v29  ;;  %v351_v33 = vpop.f32.mrb[7].mxu0  ;;  %vm238_vm5 = vcmp.ge.f32.partialorder %v233_v29, 0.0 }
 0x29a   :  { %v240_v35 = vsel %vm238_vm5, %v233_v29, %v239_v32 }
 0x29b   :  { %v248_v36 = vmul.f32 %v320_v34, %v240_v35 }
 0x29d   :  { %v250_v37 = vsel %vm249_vm6, %v248_v36, 0.0 }
 0x29e   :  { %251 = vadd.xlane.f32.xlu0 %v250_v37 }
 0x32b   :  { %v252_v39 = vpop.xlane.xlu0 %251 }
 0x32c   :  { %v260_v40 = vadd.f32 %v321_v38, %v252_v39 }
 0x32e   :  { %261 = vxpose.xlu0.b32.start.end [1/1] (short) (narrow) %v260_v40, 8 }
 0x3ae   :  { %v277_v41 = vpop.trf.xlu0 }
 0x3af   :  { %294 = vst.msk [vmem:[#allocation3] sm:$0x1] %vm293_vm7, %v277_v41 }
 0x3b0   :  { %371 = shalt.err (!%p368_p4)
}
 0x3b1   :  { %s372_s28 = scalar_lea.hbm %s493_s9, 16 }
 0x3b2   :  { %p373_p5 = scmp.ne.s32.totalorder %s493_s9, %s372_s28  ;;  %p376_p6 = scmp.lt.u32.totalorder %s372_s28, %s493_s9 }
 0x3b4   :  { %p378_p7 = pnand %p376_p6, %p373_p5 }
 0x3b6   :  { %381 = shalt.err (!%p378_p7)
}
 0x3b7   :  { %304 = dma.vmem_to_hbm [thread:$0]  %s302_s24, 16, %s493_s9, [#allocation4]  }
 0x3b8   :  { %382 = dma.done.wait [#allocation4], 16  }
 0x3b9   :  { %383 = vsyncadd [#allocation4], 4294967280 }
 0x3ba   :  { %308 = vsyncpa [#allocation4], 1 }

</bundles_post_ra>
